<compile_context>
chip_gen: v6e
topology: v6e:2x2x1
jax: 0.10.0
libtpu: 0.0.40
codegen_flags: <defaults>
</compile_context>

<pallas_src>
import functools
from typing import NamedTuple

import jax
import jax.numpy as jnp
from jax.experimental import pallas as pl
from jax.experimental.pallas import tpu as pltpu

LANE = 128                     # pad all feature dims to multiples of this
MAX_SINGLE_TILE_B = 256        # batches up to this size run as one grid step
LARGE_TILE_B = 256             # batch tile for big batches (full v6e MXU rows)
COMPUTE_DTYPE = jnp.bfloat16   # MXU input dtype (accumulation stays f32)
OUT_DTYPE = jnp.bfloat16       # kernel output slab dtype (halves writeback)


def _round_up(n, m):
    return ((n + m - 1) // m) * m


def _choose_tile_b(batch):
    """Batch tile: one big tile for small (per-timestep) batches, 256-row
    'parallel' tiles for large batches (grid >= 2 keeps both v7x TCs busy)."""
    if batch <= MAX_SINGLE_TILE_B:
        return _round_up(max(batch, 8), 8)
    return LARGE_TILE_B


class FFConfig(NamedTuple):
    input_size: int
    controller_size: int
    output_size: int
    param_size: int
    k_pad: int
    cs_pad: int
    head_pad: int


def ntm_controller_ff_kernel(x_ref, w1_ref, b1_ref, w2_ref, b2_ref,
                             wh_ref, bh_ref, out_ref):
    """One batch tile: relu(x@W1+b1) -> relu(@W2+b2) -> @[Wo|Wp]+[bo|bp]."""
    x = x_ref[...]                                                   # (TB, Kp) bf16

    h1 = jnp.dot(x, w1_ref[...], preferred_element_type=jnp.float32) + b1_ref[...]
    h1 = jnp.maximum(h1, 0.0).astype(w2_ref.dtype)   # ReLU in f32 (v5e-safe), bf16 at dot

    h2 = jnp.dot(h1, w2_ref[...], preferred_element_type=jnp.float32) + b2_ref[...]
    h2 = jnp.maximum(h2, 0.0).astype(wh_ref.dtype)

    # fused heads: one (TB, CSp) x (CSp, HEADp) matmul, lane-dense bf16 store
    out = jnp.dot(h2, wh_ref[...], preferred_element_type=jnp.float32) + bh_ref[...]
    out_ref[...] = out.astype(out_ref.dtype)


def pack_params(params, input_size, controller_size, output_size, param_size,
                compute_dtype=COMPUTE_DTYPE):
    """One-time fuse + zero-pad + cast of the parameters (do NOT call per step)."""
    k_pad = _round_up(input_size, LANE)
    cs_pad = _round_up(controller_size, LANE)
    head_pad = _round_up(output_size + param_size, LANE)

    def pad2(a, rows, cols):
        return jnp.pad(a, ((0, rows - a.shape[0]), (0, cols - a.shape[1])))

    packed = {
        "w1": pad2(params["w1"], k_pad, cs_pad).astype(compute_dtype),
        "b1": pad2(params["b1"], 1, cs_pad).astype(jnp.float32),
        "w2": pad2(params["w2"], cs_pad, cs_pad).astype(compute_dtype),
        "b2": pad2(params["b2"], 1, cs_pad).astype(jnp.float32),
        "wh": pad2(jnp.concatenate([params["wo"], params["wp"]], axis=1),
                   cs_pad, head_pad).astype(compute_dtype),
        "bh": pad2(jnp.concatenate([params["bo"], params["bp"]], axis=1),
                   1, head_pad).astype(jnp.float32),
    }
    cfg = FFConfig(input_size, controller_size, output_size, param_size,
                   k_pad, cs_pad, head_pad)
    return packed, cfg


def _resident_map(i):
    return (0, 0)


def _resident_spec(shape):
    """Constant-index weight/bias block: stays VMEM-resident across the grid.
    Single-buffer it (default double-buffering only doubles its VMEM use)."""
    try:
        return pl.BlockSpec(shape, _resident_map, pipeline_mode=pl.Buffered(1))
    except (AttributeError, TypeError):   # older Pallas without pipeline_mode
        return pl.BlockSpec(shape, _resident_map)


@functools.partial(jax.jit, static_argnums=2)
def ntm_controller_ff(x, packed, cfg):
    """Pallas forward of NTMControllerFF. Returns (out, params_out, None)."""
    w1, b1 = packed["w1"], packed["b1"]
    w2, b2 = packed["w2"], packed["b2"]
    wh, bh = packed["wh"], packed["bh"]

    B = x.shape[0]
    tile_b = _choose_tile_b(B)
    b_pad = _round_up(B, tile_b)
    grid = (b_pad // tile_b,)

    # pad batch + input features, cast to the MXU input dtype (fused under jit)
    x_p = jnp.zeros((b_pad, cfg.k_pad), COMPUTE_DTYPE)
    x_p = x_p.at[:B, :cfg.input_size].set(x.astype(COMPUTE_DTYPE))

    # VMEM budget: single-buffered weights + double-buffered x/out tiles +
    # f32 intermediates; make the scoped limit explicit (v5e's 16 MiB default
    # would otherwise bind first once tile_b / controller_size grow).
    # TODO(synk): for controller_size >~2K on v7x (64 MiB VMEM), add a second
    # grid axis tiling the fused-head N instead of shrinking tile_b.
    weight_bytes = sum(int(a.size) * a.dtype.itemsize
                       for a in (w1, b1, w2, b2, wh, bh))
    stream_bytes = (2 * tile_b * cfg.k_pad * jnp.dtype(COMPUTE_DTYPE).itemsize
                    + 2 * tile_b * cfg.head_pad * jnp.dtype(OUT_DTYPE).itemsize)
    interm_bytes = 4 * tile_b * cfg.cs_pad * 4
    vmem_limit = int(min(max(2 * weight_bytes + stream_bytes + interm_bytes
                             + (4 << 20), 32 << 20), 64 << 20))

    flops = 2 * b_pad * (cfg.k_pad * cfg.cs_pad
                         + cfg.cs_pad * cfg.cs_pad
                         + cfg.cs_pad * cfg.head_pad)
    bytes_accessed = (int(x_p.size) * x_p.dtype.itemsize + weight_bytes
                      + b_pad * cfg.head_pad * jnp.dtype(OUT_DTYPE).itemsize)

    batch_map = lambda i: (i, 0)   # stream activations per batch tile

    out_full = pl.pallas_call(
        ntm_controller_ff_kernel,
        out_shape=jax.ShapeDtypeStruct((b_pad, cfg.head_pad), OUT_DTYPE),
        grid=grid,
        in_specs=[
            pl.BlockSpec((tile_b, cfg.k_pad), batch_map),
            _resident_spec(w1.shape),
            _resident_spec(b1.shape),
            _resident_spec(w2.shape),
            _resident_spec(b2.shape),
            _resident_spec(wh.shape),
            _resident_spec(bh.shape),
        ],
        out_specs=pl.BlockSpec((tile_b, cfg.head_pad), batch_map),
        compiler_params=pltpu.CompilerParams(
            dimension_semantics=("parallel",),
            vmem_limit_bytes=vmem_limit),
        cost_estimate=pl.CostEstimate(
            flops=flops, transcendentals=0, bytes_accessed=bytes_accessed),
    )(x_p, w1, b1, w2, b2, wh, bh)

    # split the fused lane-dense slab back into the two heads (fused under jit)
    out = out_full[:B, :cfg.output_size].astype(x.dtype)
    gen = out_full[:B, cfg.output_size:cfg.output_size + cfg.param_size].astype(x.dtype)
    return out, gen, None


def init_params(key, input_size, controller_size, output_size, param_size):
    """Deterministic synthetic init (uniform, PyTorch-Linear-style ranges)."""
    def linear(k, fan_in, fan_out):
        kw, kb = jax.random.split(k)
        bound = 1.0 / jnp.sqrt(fan_in)
        # stored as (in_features, out_features) == PyTorch weight transposed
        w = jax.random.uniform(kw, (fan_in, fan_out), jnp.float32, -bound, bound)
        b = jax.random.uniform(kb, (1, fan_out), jnp.float32, -bound, bound)
        return w, b

    k1, k2, k3, k4 = jax.random.split(key, 4)
    w1, b1 = linear(k1, input_size, controller_size)
    w2, b2 = linear(k2, controller_size, controller_size)
    wo, bo = linear(k3, controller_size, output_size)
    wp, bp = linear(k4, controller_size, param_size)
    return {"w1": w1, "b1": b1, "w2": w2, "b2": b2,
            "wo": wo, "bo": bo, "wp": wp, "bp": bp}


def reference_forward(x, p):
    h = jnp.maximum(x @ p["w1"] + p["b1"], 0.0)
    h = jnp.maximum(h @ p["w2"] + p["b2"], 0.0)
    return h @ p["wo"] + p["bo"], h @ p["wp"] + p["bp"]


if __name__ == "__main__":
    key = jax.random.PRNGKey(0)
    kx, kp, kx2 = jax.random.split(key, 3)

    input_size = 32
    controller_size = 64
    output_size = 16
    param_size = 24

    raw = init_params(kp, input_size, controller_size, output_size, param_size)
    packed, cfg = pack_params(raw, input_size, controller_size,
                              output_size, param_size)

    # case 1: small per-timestep batch -> single grid step (one big tile)
    x = jax.random.normal(kx, (32, input_size), jnp.float32)
    out, gen, state = ntm_controller_ff(x, packed, cfg)
    out, gen = jax.block_until_ready((out, gen))

    ref_out, ref_gen = reference_forward(x, raw)
    assert state is None
    assert out.shape == ref_out.shape and gen.shape == ref_gen.shape
    # bf16 matmul inputs / bf16 output slab with f32 accumulation -> loosened tol
    assert jnp.allclose(out, ref_out, atol=3e-2, rtol=3e-2), \
        float(jnp.max(jnp.abs(out - ref_out)))
    assert jnp.allclose(gen, ref_gen, atol=3e-2, rtol=3e-2), \
        float(jnp.max(jnp.abs(gen - ref_gen)))

    # case 2: larger batch -> 256-row tiles, multi-step "parallel" grid
    x2 = jax.random.normal(kx2, (300, input_size), jnp.float32)
    out2, gen2, _ = ntm_controller_ff(x2, packed, cfg)
    out2, gen2 = jax.block_until_ready((out2, gen2))
    ref_out2, ref_gen2 = reference_forward(x2, raw)
    assert jnp.allclose(out2, ref_out2, atol=3e-2, rtol=3e-2), \
        float(jnp.max(jnp.abs(out2 - ref_out2)))
    assert jnp.allclose(gen2, ref_gen2, atol=3e-2, rtol=3e-2), \
        float(jnp.max(jnp.abs(gen2 - ref_gen2)))

    print("KERNEL_OK")
</pallas_src>

<mosaic_0001>
module attributes {stable_mosaic.version = 11 : i64} {
  func.func @ntm_controller_ff_kernel(%arg0: i32, %arg1: memref<32x128xbf16, #tpu.memory_space<vmem>>, %arg2: memref<128x128xbf16, #tpu.memory_space<vmem>>, %arg3: memref<1x128xf32, #tpu.memory_space<vmem>>, %arg4: memref<128x128xbf16, #tpu.memory_space<vmem>>, %arg5: memref<1x128xf32, #tpu.memory_space<vmem>>, %arg6: memref<128x128xbf16, #tpu.memory_space<vmem>>, %arg7: memref<1x128xf32, #tpu.memory_space<vmem>>, %arg8: memref<32x128xbf16, #tpu.memory_space<vmem>>) attributes {dimension_semantics = [#tpu.dimension_semantics<parallel>], iteration_bounds = array<i64: 1>, scalar_prefetch = 0 : i64, scratch_operands = 0 : i64, tpu.core_type = #tpu.core_type<tc>, window_params = [{transform_indices = @transform_0, window_bounds = array<i64: 32, 128>}, {pipeline_mode = #tpu.pipeline_mode<synchronous>, transform_indices = @transform_1, window_bounds = array<i64: 128, 128>}, {pipeline_mode = #tpu.pipeline_mode<synchronous>, transform_indices = @transform_2, window_bounds = array<i64: 1, 128>}, {pipeline_mode = #tpu.pipeline_mode<synchronous>, transform_indices = @transform_3, window_bounds = array<i64: 128, 128>}, {pipeline_mode = #tpu.pipeline_mode<synchronous>, transform_indices = @transform_4, window_bounds = array<i64: 1, 128>}, {pipeline_mode = #tpu.pipeline_mode<synchronous>, transform_indices = @transform_5, window_bounds = array<i64: 128, 128>}, {pipeline_mode = #tpu.pipeline_mode<synchronous>, transform_indices = @transform_6, window_bounds = array<i64: 1, 128>}, {transform_indices = @transform_7, window_bounds = array<i64: 32, 128>}]} {
    %c0 = arith.constant 0 : index
    %c0_0 = arith.constant 0 : index
    %0 = vector.load %arg1[%c0, %c0_0] : memref<32x128xbf16, #tpu.memory_space<vmem>>, vector<32x128xbf16>
    %c0_1 = arith.constant 0 : index
    %c0_2 = arith.constant 0 : index
    %1 = vector.load %arg2[%c0_1, %c0_2] : memref<128x128xbf16, #tpu.memory_space<vmem>>, vector<128x128xbf16>
    %cst = arith.constant dense<0.000000e+00> : vector<32x128xf32>
    %2 = tpu.matmul %0, %1, %cst {dimension_numbers = #tpu.dot_dimension_numbers<[1], [0], [0], [1], [0, 0, 1, 1], [], []>} : vector<32x128xbf16>, vector<128x128xbf16>, vector<32x128xf32> -> vector<32x128xf32>
    %c0_3 = arith.constant 0 : index
    %c0_4 = arith.constant 0 : index
    %3 = vector.load %arg3[%c0_3, %c0_4] : memref<1x128xf32, #tpu.memory_space<vmem>>, vector<1x128xf32>
    %4 = vector.broadcast %3 : vector<1x128xf32> to vector<32x128xf32>
    %5 = arith.addf %2, %4 : vector<32x128xf32>
    %cst_5 = arith.constant 0.000000e+00 : f32
    %6 = vector.broadcast %cst_5 : f32 to vector<32x128xf32>
    %7 = arith.maximumf %5, %6 : vector<32x128xf32>
    %8 = arith.truncf %7 : vector<32x128xf32> to vector<32x128xbf16>
    %c0_6 = arith.constant 0 : index
    %c0_7 = arith.constant 0 : index
    %9 = vector.load %arg4[%c0_6, %c0_7] : memref<128x128xbf16, #tpu.memory_space<vmem>>, vector<128x128xbf16>
    %cst_8 = arith.constant dense<0.000000e+00> : vector<32x128xf32>
    %10 = tpu.matmul %8, %9, %cst_8 {dimension_numbers = #tpu.dot_dimension_numbers<[1], [0], [0], [1], [0, 0, 1, 1], [], []>} : vector<32x128xbf16>, vector<128x128xbf16>, vector<32x128xf32> -> vector<32x128xf32>
    %c0_9 = arith.constant 0 : index
    %c0_10 = arith.constant 0 : index
    %11 = vector.load %arg5[%c0_9, %c0_10] : memref<1x128xf32, #tpu.memory_space<vmem>>, vector<1x128xf32>
    %12 = vector.broadcast %11 : vector<1x128xf32> to vector<32x128xf32>
    %13 = arith.addf %10, %12 : vector<32x128xf32>
    %cst_11 = arith.constant 0.000000e+00 : f32
    %14 = vector.broadcast %cst_11 : f32 to vector<32x128xf32>
    %15 = arith.maximumf %13, %14 : vector<32x128xf32>
    %16 = arith.truncf %15 : vector<32x128xf32> to vector<32x128xbf16>
    %c0_12 = arith.constant 0 : index
    %c0_13 = arith.constant 0 : index
    %17 = vector.load %arg6[%c0_12, %c0_13] : memref<128x128xbf16, #tpu.memory_space<vmem>>, vector<128x128xbf16>
    %cst_14 = arith.constant dense<0.000000e+00> : vector<32x128xf32>
    %18 = tpu.matmul %16, %17, %cst_14 {dimension_numbers = #tpu.dot_dimension_numbers<[1], [0], [0], [1], [0, 0, 1, 1], [], []>} : vector<32x128xbf16>, vector<128x128xbf16>, vector<32x128xf32> -> vector<32x128xf32>
    %c0_15 = arith.constant 0 : index
    %c0_16 = arith.constant 0 : index
    %19 = vector.load %arg7[%c0_15, %c0_16] : memref<1x128xf32, #tpu.memory_space<vmem>>, vector<1x128xf32>
    %20 = vector.broadcast %19 : vector<1x128xf32> to vector<32x128xf32>
    %21 = arith.addf %18, %20 : vector<32x128xf32>
    %22 = arith.truncf %21 : vector<32x128xf32> to vector<32x128xbf16>
    %c0_17 = arith.constant 0 : index
    %c0_18 = arith.constant 0 : index
    %23 = vector.load %arg8[%c0_17, %c0_18] : memref<32x128xbf16, #tpu.memory_space<vmem>>, vector<32x128xbf16>
    tpu.vector_store %arg8[%c0_17, %c0_18], %22 {strides = array<i32>} : memref<32x128xbf16, #tpu.memory_space<vmem>>, vector<32x128xbf16>,
    return
  }
  func.func @transform_0(%arg0: i32) -> (i32, i32) {
    %c0_i32 = arith.constant 0 : i32
    %c0_i32_0 = arith.constant 0 : i32
    return %arg0, %c0_i32 : i32, i32
  }
  func.func @transform_1(%arg0: i32) -> (i32, i32) {
    %c0_i32 = arith.constant 0 : i32
    %c0_i32_0 = arith.constant 0 : i32
    %c0_i32_1 = arith.constant 0 : i32
    return %c0_i32, %c0_i32_0 : i32, i32
  }
  func.func @transform_2(%arg0: i32) -> (i32, i32) {
    %c0_i32 = arith.constant 0 : i32
    %c0_i32_0 = arith.constant 0 : i32
    %c0_i32_1 = arith.constant 0 : i32
    return %c0_i32, %c0_i32_0 : i32, i32
  }
  func.func @transform_3(%arg0: i32) -> (i32, i32) {
    %c0_i32 = arith.constant 0 : i32
    %c0_i32_0 = arith.constant 0 : i32
    %c0_i32_1 = arith.constant 0 : i32
    return %c0_i32, %c0_i32_0 : i32, i32
  }
  func.func @transform_4(%arg0: i32) -> (i32, i32) {
    %c0_i32 = arith.constant 0 : i32
    %c0_i32_0 = arith.constant 0 : i32
    %c0_i32_1 = arith.constant 0 : i32
    return %c0_i32, %c0_i32_0 : i32, i32
  }
  func.func @transform_5(%arg0: i32) -> (i32, i32) {
    %c0_i32 = arith.constant 0 : i32
    %c0_i32_0 = arith.constant 0 : i32
    %c0_i32_1 = arith.constant 0 : i32
    return %c0_i32, %c0_i32_0 : i32, i32
  }
  func.func @transform_6(%arg0: i32) -> (i32, i32) {
    %c0_i32 = arith.constant 0 : i32
    %c0_i32_0 = arith.constant 0 : i32
    %c0_i32_1 = arith.constant 0 : i32
    return %c0_i32, %c0_i32_0 : i32, i32
  }
  func.func @transform_7(%arg0: i32) -> (i32, i32) {
    %c0_i32 = arith.constant 0 : i32
    %c0_i32_0 = arith.constant 0 : i32
    return %arg0, %c0_i32 : i32, i32
  }
}

</mosaic_0001>

<bundles_post_ra>
// kernel: ntm_controller_ff.1
= control target key start
LH: loop header
LB: loop body
LE: loop exit
PB: predicated region body
PF: predicated region fallthrough
CT: control target
= control target key end

     0   :  { %12 = vsyncpa [#allocation3], 0  ;;  %s776_s0 = inlined_call_operand.vmem [shape: bf16[32,128], index: 0, kind: input, shape index: {}]   ;;  %s777_s1 = inlined_call_operand.vmem [shape: bf16[128,128], index: 1, kind: input, shape index: {}]   ;;  %s778_s2 = inlined_call_operand.vmem [shape: f32[1,128], index: 2, kind: input, shape index: {}]   ;;  %s779_s3 = inlined_call_operand.hbm [shape: bf16[128,128], index: 3, kind: input, shape index: {}]   ;;  %s780_s4 = inlined_call_operand.vmem [shape: f32[1,128], index: 4, kind: input, shape index: {}]   ;;  %s781_s5 = inlined_call_operand.hbm [shape: bf16[128,128], index: 5, kind: input, shape index: {}]   ;;  %s782_s6 = inlined_call_operand.vmem [shape: f32[1,128], index: 6, kind: input, shape index: {}]   ;;  %s783_s7 = inlined_call_operand.vmem [shape: bf16[32,128], index: 7, kind: output, shape index: {}]  }
   0x1   :  { %13 = vsyncpa [#allocation5], 0  ;;  %s681_s24 = smov [#allocation2]  }
   0x2   :  { %s25_s25 = sshll.u32 %s681_s24, 4  ;;  %s26_s25 = int_to_ptr.vmem [resolvable:$true] %s25_s25 }
   0x3   :  { %s645_s26 = scalar_lea.vmem %s26_s25, 1024  ;;  %p650_p1 = scmp.lt.s32.totalorder %s26_s25, %s26_s25 }
   0x4   :  { %p646_p0 = scmp.ne.s32.totalorder %s26_s25, %s645_s26  ;;  %p651_p2 = scmp.lt.s32.totalorder %s645_s26, %s645_s26 }
   0x6   :  { %p652_p3 = por %p651_p2, %p650_p1 }
   0x8   :  { %p653_p4 = pnand %p652_p3, %p646_p0 }
   0xa   :  { %656 = shalt.err (!%p653_p4)
}
   0xb   :  { %s682_s27 = smov 64   ;;  %s683_s28 = smov 4  }
   0xc   :  { %31 = dma.hbm_to_vmem [thread:$0]  %s779_s3, 1024, %s26_s25, [#allocation3], %s682_s27, %s682_s27, %s683_s28  }
   0xd   :  { %s684_s8 = smov [#allocation4]  }
   0xe   :  { %s39_s9 = sshll.u32 %s684_s8, 4  ;;  %s40_s9 = int_to_ptr.vmem [resolvable:$true] %s39_s9 }
   0xf   :  { %s665_s10 = scalar_lea.vmem %s40_s9, 1024  ;;  %p670_p6 = scmp.lt.s32.totalorder %s40_s9, %s40_s9 }
  0x10   :  { %p666_p5 = scmp.ne.s32.totalorder %s40_s9, %s665_s10  ;;  %p671_p7 = scmp.lt.s32.totalorder %s665_s10, %s665_s10 }
  0x12   :  { %p672_p8 = por %p671_p7, %p670_p6 }
  0x14   :  { %p673_p9 = pnand %p672_p8, %p666_p5 }
  0x16   :  { %676 = shalt.err (!%p673_p9)
}
  0x17   :  { %45 = dma.hbm_to_vmem [thread:$0]  %s781_s5, 1024, %s40_s9, [#allocation5], %s682_s27, %s682_s27, %s683_s28  }
  0x18   :  { %677 = dma.done.wait [#allocation3], 1024  }
  0x19   :  { %678 = vsyncadd [#allocation3], 4294966272 }
  0x1a   :  { %679 = dma.done.wait [#allocation5], 1024  }
  0x1b   :  { %680 = vsyncadd [#allocation5], 4294966272  ;;  %v611_v0 = vld [vmem:[%s777_s1 + $0x38] sm:$0xff]   ;;  %v612_v1 = vld [vmem:[%s777_s1 + $0x30] sm:$0xff]  }
  0x1c   :  { %547 = vmatprep.subr.bf16.mxu0 %v611_v0  ;;  %v613_v2 = vld [vmem:[%s777_s1 + $0x28] sm:$0xff]   ;;  %v614_v3 = vld [vmem:[%s777_s1 + $0x20] sm:$0xff]   ;;  %v621_v5 = vld [vmem:[#allocation2 + $0x38] sm:$0xff]  }
  0x1d   :  { %548 = vmatpush3.bf16.msra.mxu0 %v611_v0  ;;  %v619_v4 = vld [vmem:[%s776_s0] sm:$0xff]   ;;  %v622_v6 = vld [vmem:[#allocation2 + $0x30] sm:$0xff]   ;;  %v615_v7 = vld [vmem:[%s777_s1 + $0x18] sm:$0xff]   ;;  %567 = vmatprep.subr.bf16.mxu1 %v621_v5 }
  0x1e   :  { %549 = vmatprep.subr.bf16.mxu0 %v612_v1  ;;  %563 = vmatprep.mubr.bf16.mxu0 %v619_v4  ;;  %v616_v8 = vld [vmem:[%s777_s1 + $0x10] sm:$0xff]   ;;  %v623_v9 = vld [vmem:[#allocation2 + $0x28] sm:$0xff]   ;;  %v624_v10 = vld [vmem:[#allocation2 + $0x20] sm:$0xff]  }
  0x1f   :  { %568 = vmatpush3.bf16.msra.mxu1 %v621_v5  ;;  %v617_v11 = vld [vmem:[%s777_s1 + $0x8] sm:$0xff]   ;;  %v625_v12 = vld [vmem:[#allocation2 + $0x18] sm:$0xff]   ;;  %v618_v13 = vld [vmem:[%s777_s1] sm:$0xff]  }
  0x20   :  { %569 = vmatprep.subr.bf16.mxu1 %v622_v6  ;;  %v620_v14 = vld [vmem:[%s776_s0 + $0x8] sm:$0xff]   ;;  %v626_v15 = vld [vmem:[#allocation2 + $0x10] sm:$0xff]   ;;  %v628_v17 = vld [vmem:[#allocation2] sm:$0xff]  }
  0x21   :  { %550 = vmatpush3.bf16.msra.mxu0 %v612_v1  ;;  %v627_v16 = vld [vmem:[#allocation2 + $0x8] sm:$0xff]   ;;  %v629_v18 = vld [vmem:[#allocation4 + $0x38] sm:$0xff]   ;;  %v630_v19 = vld [vmem:[#allocation4 + $0x30] sm:$0xff]  }
  0x22   :  { %551 = vmatprep.subr.bf16.mxu0 %v613_v2  ;;  %v631_v20 = vld [vmem:[#allocation4 + $0x28] sm:$0xff]   ;;  %v632_v21 = vld [vmem:[#allocation4 + $0x20] sm:$0xff]   ;;  %v633_v22 = vld [vmem:[#allocation4 + $0x18] sm:$0xff]  }
  0x23   :  { %570 = vmatpush3.bf16.msra.mxu1 %v622_v6  ;;  %v469_v25 = vld [vmem:[%s778_s2] ss:$0 sm:$0xff]  ;;  %v634_v38 = vld [vmem:[#allocation4 + $0x10] sm:$0xff]   ;;  %v635_v39 = vld [vmem:[#allocation4 + $0x8] sm:$0xff]  }
  0x24   :  { %571 = vmatprep.subr.bf16.mxu1 %v623_v9  ;;  %v636_v40 = vld [vmem:[#allocation4] sm:$0xff]  }
  0x25   :  { %552 = vmatpush3.bf16.msra.mxu0 %v613_v2  ;;  %v480_v43 = vld [vmem:[%s780_s4] ss:$0 sm:$0xff] }
  0x26   :  { %553 = vmatprep.subr.bf16.mxu0 %v614_v3  ;;  %v489_v57 = vld [vmem:[%s782_s6] ss:$0 sm:$0xff] }
  0x27   :  { %572 = vmatpush3.bf16.msra.mxu1 %v623_v9 }
  0x28   :  { %573 = vmatprep.subr.bf16.mxu1 %v624_v10 }
  0x29   :  { %554 = vmatpush3.bf16.msra.mxu0 %v614_v3 }
  0x2a   :  { %555 = vmatprep.subr.bf16.mxu0 %v615_v7 }
  0x2b   :  { %574 = vmatpush3.bf16.msra.mxu1 %v624_v10 }
  0x2c   :  { %575 = vmatprep.subr.bf16.mxu1 %v625_v12 }
  0x2d   :  { %556 = vmatpush3.bf16.msra.mxu0 %v615_v7 }
  0x2e   :  { %557 = vmatprep.subr.bf16.mxu0 %v616_v8 }
  0x2f   :  { %576 = vmatpush3.bf16.msra.mxu1 %v625_v12 }
  0x30   :  { %577 = vmatprep.subr.bf16.mxu1 %v626_v15 }
  0x31   :  { %558 = vmatpush3.bf16.msra.mxu0 %v616_v8 }
  0x32   :  { %559 = vmatprep.subr.bf16.mxu0 %v617_v11 }
  0x33   :  { %578 = vmatpush3.bf16.msra.mxu1 %v626_v15 }
  0x34   :  { %579 = vmatprep.subr.bf16.mxu1 %v627_v16 }
  0x35   :  { %560 = vmatpush3.bf16.msra.mxu0 %v617_v11 }
  0x36   :  { %561 = vmatprep.subr.bf16.mxu0 %v618_v13 }
  0x37   :  { %580 = vmatpush3.bf16.msra.mxu1 %v627_v16 }
  0x38   :  { %581 = vmatprep.subr.bf16.mxu1 %v628_v17 }
  0x39   :  { %562 = vmatpush3.bf16.msra.mxu0 %v618_v13 }
  0x3a   :  { %587 = vmatprep.subr.bf16.mxu0 %v629_v18 }
  0x3b   :  { %582 = vmatpush3.bf16.msra.mxu1 %v628_v17 }
  0x3c   :  { %564 = vmatmul.mubr.bf16.vlgmr.msra.gmra.mxu0 %v620_v14 }
  0x3d   :  { %588 = vmatpush3.bf16.msra.mxu0 %v629_v18 }
  0x3e   :  { %589 = vmatprep.subr.bf16.mxu0 %v630_v19 }
  0x41   :  { %590 = vmatpush3.bf16.msra.mxu0 %v630_v19 }
  0x42   :  { %591 = vmatprep.subr.bf16.mxu0 %v631_v20 }
  0x45   :  { %592 = vmatpush3.bf16.msra.mxu0 %v631_v20 }
  0x46   :  { %593 = vmatprep.subr.bf16.mxu0 %v632_v21 }
  0x49   :  { %594 = vmatpush3.bf16.msra.mxu0 %v632_v21 }
  0x4a   :  { %595 = vmatprep.subr.bf16.mxu0 %v633_v22 }
  0x4d   :  { %596 = vmatpush3.bf16.msra.mxu0 %v633_v22 }
  0x4e   :  { %597 = vmatprep.subr.bf16.mxu0 %v634_v38 }
  0x51   :  { %598 = vmatpush3.bf16.msra.mxu0 %v634_v38 }
  0x52   :  { %599 = vmatprep.subr.bf16.mxu0 %v635_v39 }
  0x55   :  { %600 = vmatpush3.bf16.msra.mxu0 %v635_v39 }
  0x56   :  { %601 = vmatprep.subr.bf16.mxu0 %v636_v40 }
  0x59   :  { %602 = vmatpush3.bf16.msra.mxu0 %v636_v40 }
  0xfc   :  { %v565_v23 = vpop.f32.mrf.mxu0 }
  0xfd   :  { %v185_v29 = vadd.f32 %v565_v23, %v469_v25 }
  0xfe   :  { %v176_v24 = vpop.f32.mrf.mxu0 }
  0xff   :  { %v177_v27 = vadd.f32 %v469_v25, %v176_v24  ;;  %v193_v35 = vmax.f32 %v185_v29, 0.0 }
 0x100   :  { %v566_v26 = vpop.f32.mrf.mxu0 }
 0x101   :  { %v188_v28 = vadd.f32 %v566_v26, %v469_v25  ;;  %v191_v33 = vmax.f32 %v177_v27, 0.0 }
 0x102   :  { %v179_v30 = vpop.f32.mrf.mxu0 }
 0x103   :  { %v180_v31 = vadd.f32 %v469_v25, %v179_v30  ;;  %v194_v32 = vmax.f32 %v188_v28, 0.0 }
 0x105   :  { %v192_v34 = vmax.f32 %v180_v31, 0.0  ;;  %v196_v37 = vpack.c.bf16 %v194_v32, %v193_v35 }
 0x107   :  { %v195_v36 = vpack.c.bf16 %v192_v34, %v191_v33 }
 0x109   :  { %583 = vmatprep.mubr.bf16.mxu1 %v195_v36 }
 0x10a   :  { %584 = vmatmul.mubr.bf16.vlgmr.msra.gmra.mxu1 %v196_v37 }
 0x1ca   :  { %v585_v41 = vpop.f32.mrf.mxu1 }
 0x1cb   :  { %v311_v47 = vadd.f32 %v585_v41, %v480_v43 }
 0x1cc   :  { %v302_v42 = vpop.f32.mrf.mxu1 }
 0x1cd   :  { %v303_v45 = vadd.f32 %v480_v43, %v302_v42  ;;  %v319_v53 = vmax.f32 %v311_v47, 0.0 }
 0x1ce   :  { %v586_v44 = vpop.f32.mrf.mxu1 }
 0x1cf   :  { %v314_v46 = vadd.f32 %v586_v44, %v480_v43  ;;  %v317_v51 = vmax.f32 %v303_v45, 0.0 }
 0x1d0   :  { %v305_v48 = vpop.f32.mrf.mxu1 }
 0x1d1   :  { %v306_v49 = vadd.f32 %v480_v43, %v305_v48  ;;  %v320_v50 = vmax.f32 %v314_v46, 0.0 }
 0x1d3   :  { %v318_v52 = vmax.f32 %v306_v49, 0.0  ;;  %v322_v55 = vpack.c.bf16 %v320_v50, %v319_v53 }
 0x1d5   :  { %v321_v54 = vpack.c.bf16 %v318_v52, %v317_v51 }
 0x1d7   :  { %603 = vmatprep.mubr.bf16.mxu0 %v321_v54 }
 0x1d8   :  { %604 = vmatmul.mubr.bf16.vlgmr.msra.gmra.mxu0 %v322_v55 }
 0x298   :  { %v605_v56 = vpop.f32.mrf.mxu0 }
 0x299   :  { %v437_v60 = vadd.f32 %v605_v56, %v489_v57 }
 0x29a   :  { %v428_v58 = vpop.f32.mrf.mxu0 }
 0x29b   :  { %v429_v63 = vadd.f32 %v489_v57, %v428_v58 }
 0x29c   :  { %v606_v59 = vpop.f32.mrf.mxu0 }
 0x29d   :  { %v440_v61 = vadd.f32 %v606_v59, %v489_v57 }
 0x29e   :  { %v431_v62 = vpop.f32.mrf.mxu0 }
 0x29f   :  { %v514_v0 = vpack.c.bf16 %v440_v61, %v437_v60  ;;  %v432_v1 = vadd.f32 %v489_v57, %v431_v62 }
 0x2a1   :  { %516 = vst [vmem:[%s783_s7 + $0x8] sm:$0xff] %v514_v0   ;;  %v509_v2 = vpack.c.bf16 %v432_v1, %v429_v63 }
 0x2a3   :  { %510 = vst [vmem:[%s783_s7] sm:$0xff] %v509_v2  }
 0x2a4   :  { %467 = vsyncpa [#allocation3], 1 }
 0x2a5   :  { %468 = vsyncpa [#allocation5], 1 }

</bundles_post_ra>
